<compile_context>
chip_gen: v7x
topology: tpu7x:2x2x1
jax: 0.10.0
libtpu: 0.0.40
codegen_flags: <defaults>
</compile_context>

<pallas_src>
import functools

import jax
import jax.numpy as jnp
from jax.experimental import pallas as pl
from jax.experimental.pallas import tpu as pltpu

LANES = 128              # vreg lane width
ACC_ROWS = 8             # one f32 vreg = (8, 128)
SUB_ROWS = 128           # rows per in-kernel fori_loop step (16 f32 vregs/array)
MAX_BLOCK_ROWS = 8192    # (8192,128) f32 tile = 4 MiB; 2 inputs x 2 bufs = 16 MiB
MIN_SPLIT_ROWS = 512     # only split across TensorCores when there is enough work
VMEM_LIMIT_BYTES = 32 * 1024 * 1024
NEG_BIG = -1.0e9         # pad logit: (1-0)*x + softplus(-x) == 0 exactly


def _cdiv(a, b):
    return (a + b - 1) // b


def _round_up(x, m):
    return _cdiv(x, m) * m


def _num_tensorcores():
    """Best-effort TensorCores-per-chip; None when it cannot be determined."""
    try:
        info = pltpu.get_tpu_info()
    except Exception:
        return None
    for name in ("num_cores", "core_count", "num_tensorcores",
                 "tensorcore_count", "cores_per_chip", "num_cores_per_chip"):
        val = getattr(info, name, None)
        if isinstance(val, int) and val > 0:
            return val
    return None


def _bce_reduce_kernel(pred_ref, label_ref, acc_ref, *, block_rows, sub_rows,
                       tiles_per_split, valid_rows, needs_mask):
    """Accumulate A / B / sum(y) partials into a resident (24,128) f32 block."""
    c = pl.program_id(0)   # TensorCore-split axis ("parallel")
    i = pl.program_id(1)   # sequential reduction axis ("arbitrary")

    @pl.when(i == 0)
    def _():
        acc_ref[...] = jnp.zeros_like(acc_ref)

    num_sub = block_rows // sub_rows
    tile_start_row = (c * tiles_per_split + i) * block_rows   # logical, unclamped

    def partial_sums(masked):
        zero8 = jnp.zeros((ACC_ROWS, LANES), jnp.float32)

        def body(j, carry):
            a8, b8, y8 = carry
            r0 = pl.multiple_of(j * sub_rows, sub_rows)
            x = pred_ref[pl.ds(r0, sub_rows), :].astype(jnp.float32)
            y = label_ref[pl.ds(r0, sub_rows), :].astype(jnp.float32)
            neg_x = -x
            # stable softplus(-x) = log1p(exp(-|x|)) + relu(-x); reuse neg_x.
            s = jnp.log1p(jnp.exp(jnp.minimum(neg_x, x))) + jnp.maximum(neg_x, 0.0)
            ta = (1.0 - y) * x + s       # per-element "A" term
            tb = y * s                   # per-element "B" term
            if masked:
                grow = (tile_start_row + r0
                        + jax.lax.broadcasted_iota(jnp.int32, (sub_rows, LANES), 0))
                keep = grow < valid_rows
                fzero = jnp.float32(0.0)
                # select (not multiply): Pallas-padded block rows may hold
                # garbage / NaN / Inf; where() discards them safely.
                ta = jnp.where(keep, ta, fzero)
                tb = jnp.where(keep, tb, fzero)
                y = jnp.where(keep, y, fzero)

            def fold(t):   # (sub_rows,128) -> (8,128): pure vreg adds, no relayout
                return t.reshape(sub_rows // ACC_ROWS, ACC_ROWS, LANES).sum(axis=0)

            return a8 + fold(ta), b8 + fold(tb), y8 + fold(y)

        return jax.lax.fori_loop(0, num_sub, body, (zero8, zero8, zero8))

    def accumulate(sums):
        a8, b8, y8 = sums
        acc_ref[0 * ACC_ROWS:1 * ACC_ROWS, :] += a8
        acc_ref[1 * ACC_ROWS:2 * ACC_ROWS, :] += b8
        acc_ref[2 * ACC_ROWS:3 * ACC_ROWS, :] += y8

    if needs_mask:
        # Only tiles whose logical row range extends past the valid rows need
        # masking (last real tile and any phantom trailing tiles).
        overflows = tile_start_row + block_rows > valid_rows

        @pl.when(jnp.logical_not(overflows))
        def _():
            accumulate(partial_sums(False))

        @pl.when(overflows)
        def _():
            accumulate(partial_sums(True))
    else:
        accumulate(partial_sums(False))


def keypoint_bce_loss(pred, label):
    """Pallas implementation of KeyPointBCELoss.forward(pred, label)."""
    out_dtype = pred.dtype
    label = label.astype(pred.dtype)          # matches torch: label.to(pred.dtype)

    n_valid = pred.size
    if n_valid == 0:                           # degenerate; torch would also NaN
        return jnp.float32(float("nan")).astype(out_dtype)

    flat_pred = pred.reshape(-1)               # bitcast; keep native dtype in HBM
    flat_label = label.reshape(-1)

    # Lane alignment: pad at most 127 elements.  Padded logits are a large
    # negative value so (1-y)*x + softplus(-x) cancels to exactly 0 and y == 0,
    # i.e. padding contributes nothing to A, B or sum(y).
    # TODO(synk): for huge non-128-divisible tensors this jnp.pad still copies
    # both arrays once; an in-kernel ragged tail would avoid that.
    lane_pad = (-n_valid) % LANES
    if lane_pad:
        flat_pred = jnp.pad(flat_pred, (0, lane_pad), constant_values=NEG_BIG)
        flat_label = jnp.pad(flat_label, (0, lane_pad), constant_values=0)

    rows = flat_pred.size // LANES
    pred2d = flat_pred.reshape(rows, LANES)
    label2d = flat_label.reshape(rows, LANES)

    # Split the streaming reduction across TensorCores whenever there is enough
    # work; on v7x "parallel" shards the axis across the 2 TCs, on v5e/v6e a
    # singleton/extra axis just iterates (near-zero cost).
    cores = _num_tensorcores()
    can_split = cores is None or cores >= 2
    num_splits = 2 if (can_split and rows >= MIN_SPLIT_ROWS) else 1

    block_rows = min(MAX_BLOCK_ROWS, _round_up(_cdiv(rows, num_splits), SUB_ROWS))
    nblocks = _cdiv(rows, block_rows)               # real blocks in the array
    tiles_per_split = _cdiv(nblocks, num_splits)    # logical tiles per core
    covered_rows = num_splits * tiles_per_split * block_rows
    needs_mask = covered_rows != rows

    clamp_idx = (num_splits * tiles_per_split) != nblocks
    last_block = nblocks - 1

    def in_index(c, i):
        idx = c * tiles_per_split + i
        if clamp_idx:
            # Phantom trailing tiles re-read the last real block (in-bounds DMA);
            # the kernel's row mask zeroes their contribution.
            idx = jnp.minimum(idx, last_block)
        return (idx, 0)

    in_spec = pl.BlockSpec((block_rows, LANES), in_index)
    acc_spec = pl.BlockSpec((3 * ACC_ROWS, LANES), lambda c, i: (c, 0))

    kernel = functools.partial(
        _bce_reduce_kernel,
        block_rows=block_rows,
        sub_rows=SUB_ROWS,
        tiles_per_split=tiles_per_split,
        valid_rows=rows,
        needs_mask=needs_mask,
    )

    acc = pl.pallas_call(
        kernel,
        out_shape=jax.ShapeDtypeStruct((num_splits * 3 * ACC_ROWS, LANES),
                                       jnp.float32),
        grid_spec=pltpu.PrefetchScalarGridSpec(
            num_scalar_prefetch=0,
            grid=(num_splits, tiles_per_split),
            in_specs=[in_spec, in_spec],
            out_specs=acc_spec,
        ),
        compiler_params=pltpu.CompilerParams(
            dimension_semantics=("parallel", "arbitrary"),
            vmem_limit_bytes=VMEM_LIMIT_BYTES),
    )(pred2d, label2d)

    # Tiny XLA epilogue: one reduction over num_splits*3*8*128 floats + scalars.
    sums = acc.reshape(num_splits, 3, ACC_ROWS * LANES).sum(axis=(0, 2))
    a, b, sum_y = sums[0], sums[1], sums[2]

    n = jnp.float32(n_valid)
    pos_weight = n / sum_y     # = 1/label.mean(); all-zero labels -> inf/NaN, same as torch
    loss = (a + (pos_weight - 1.0) * b) / n
    return loss.astype(out_dtype)


def _reference_loss(pred, label):
    """Pure-JAX reference mirroring torch BCEWithLogitsLoss(pos_weight=1/mean)."""
    x = pred.astype(jnp.float32)
    y = label.astype(jnp.float32)
    p = 1.0 / jnp.mean(y)
    s = jnp.log1p(jnp.exp(-jnp.abs(x))) + jnp.maximum(-x, 0.0)
    return jnp.mean((1.0 - y) * x + (1.0 + (p - 1.0) * y) * s)


if __name__ == "__main__":
    key = jax.random.PRNGKey(0)
    k1, k2, k3, k4 = jax.random.split(key, 4)

    # Primary example: keypoint heatmap head logits/targets (N, C, H, W).
    pred = jax.random.normal(k1, (2, 4, 16, 16), dtype=jnp.float32)
    label = (jax.random.uniform(k2, (2, 4, 16, 16)) > 0.7).astype(jnp.float32)
    loss = keypoint_bce_loss(pred, label)
    jax.block_until_ready(loss)
    ref = _reference_loss(pred, label)
    assert jnp.allclose(loss, ref, rtol=1e-5, atol=1e-6), (loss, ref)

    # Extra coverage: multi-tile + TensorCore-split + unmasked fast path.
    pred2 = jax.random.normal(k3, (2, 8, 64, 64), dtype=jnp.float32)
    label2 = (jax.random.uniform(k4, (2, 8, 64, 64)) > 0.9).astype(jnp.float32)
    loss2 = keypoint_bce_loss(pred2, label2)
    jax.block_until_ready(loss2)
    ref2 = _reference_loss(pred2, label2)
    assert jnp.allclose(loss2, ref2, rtol=1e-4, atol=1e-6), (loss2, ref2)

    # Extra coverage: ragged element count (not a multiple of 128) -> pad path.
    pred3 = jax.random.normal(k1, (2, 3, 17, 25), dtype=jnp.float32)
    label3 = (jax.random.uniform(k2, (2, 3, 17, 25)) > 0.7).astype(jnp.float32)
    loss3 = keypoint_bce_loss(pred3, label3)
    jax.block_until_ready(loss3)
    ref3 = _reference_loss(pred3, label3)
    assert jnp.allclose(loss3, ref3, rtol=1e-5, atol=1e-6), (loss3, ref3)

    print("KERNEL_OK")
</pallas_src>

<mosaic_0001>
module attributes {stable_mosaic.version = 11 : i64} {
  func.func @_bce_reduce_kernel(%arg0: i32, %arg1: i32, %arg2: memref<128x128xf32, #tpu.memory_space<vmem>>, %arg3: memref<128x128xf32, #tpu.memory_space<vmem>>, %arg4: memref<24x128xf32, #tpu.memory_space<vmem>>) attributes {dimension_semantics = [#tpu.dimension_semantics<parallel>, #tpu.dimension_semantics<arbitrary>], iteration_bounds = array<i64: 1, 1>, scalar_prefetch = 0 : i64, scratch_operands = 0 : i64, tpu.core_type = #tpu.core_type<tc>, window_params = [{transform_indices = @transform_0, window_bounds = array<i64: 128, 128>}, {transform_indices = @transform_1, window_bounds = array<i64: 128, 128>}, {transform_indices = @transform_2, window_bounds = array<i64: 24, 128>}]} {
    %c0_i32 = arith.constant 0 : i32
    %0 = arith.cmpi eq, %arg1, %c0_i32 : i32
    %1 = arith.extui %0 : i1 to i32
    %c0_i32_0 = arith.constant 0 : i32
    %2 = arith.cmpi ne, %1, %c0_i32_0 : i32
    scf.if %2 {
      %cst = arith.constant 0.000000e+00 : f32
      %13 = vector.broadcast %cst : f32 to vector<24x128xf32>
      %c0 = arith.constant 0 : index
      %c0_4 = arith.constant 0 : index
      %14 = vector.load %arg4[%c0, %c0_4] : memref<24x128xf32, #tpu.memory_space<vmem>>, vector<24x128xf32>
      tpu.vector_store %arg4[%c0, %c0_4], %13 {strides = array<i32>} : memref<24x128xf32, #tpu.memory_space<vmem>>, vector<24x128xf32>,
    } else {
    }
    %c1_i32 = arith.constant 1 : i32
    %3 = arith.muli %arg0, %c1_i32 : i32
    %4 = arith.addi %3, %arg1 : i32
    %c128_i32 = arith.constant 128 : i32
    %5 = arith.muli %4, %c128_i32 : i32
    %c128_i32_1 = arith.constant 128 : i32
    %6 = arith.addi %5, %c128_i32_1 : i32
    %c16_i32 = arith.constant 16 : i32
    %7 = arith.cmpi sgt, %6, %c16_i32 : i32
    %true = arith.constant true
    %8 = arith.xori %7, %true : i1
    %9 = arith.extui %8 : i1 to i32
    %c0_i32_2 = arith.constant 0 : i32
    %10 = arith.cmpi ne, %9, %c0_i32_2 : i32
    scf.if %10 {
      %cst = arith.constant 0.000000e+00 : f32
      %13 = vector.broadcast %cst : f32 to vector<8x128xf32>
      %c0_i32_4 = arith.constant 0 : i32
      %c128_i32_5 = arith.constant 128 : i32
      %14 = arith.muli %c0_i32_4, %c128_i32_5 : i32
      %15 = tpu.assume_multiple %14, 128 : i32
      %16 = arith.index_cast %15 : i32 to index
      %c0 = arith.constant 0 : index
      %17 = vector.load %arg2[%16, %c0] : memref<128x128xf32, #tpu.memory_space<vmem>>, vector<128x128xf32>
      %18 = arith.index_cast %15 : i32 to index
      %c0_6 = arith.constant 0 : index
      %19 = vector.load %arg3[%18, %c0_6] : memref<128x128xf32, #tpu.memory_space<vmem>>, vector<128x128xf32>
      %cst_7 = arith.constant 0.000000e+00 : f32
      %20 = vector.broadcast %cst_7 : f32 to vector<128x128xf32>
      %21 = arith.subf %20, %17 : vector<128x128xf32>
      %22 = arith.minimumf %21, %17 : vector<128x128xf32>
      %23 = math.exp %22 : vector<128x128xf32>
      %24 = math.log1p %23 : vector<128x128xf32>
      %cst_8 = arith.constant 0.000000e+00 : f32
      %25 = vector.broadcast %cst_8 : f32 to vector<128x128xf32>
      %26 = arith.maximumf %21, %25 : vector<128x128xf32>
      %27 = arith.addf %24, %26 : vector<128x128xf32>
      %cst_9 = arith.constant 1.000000e+00 : f32
      %28 = vector.broadcast %cst_9 : f32 to vector<128x128xf32>
      %29 = arith.subf %28, %19 : vector<128x128xf32>
      %30 = arith.mulf %29, %17 : vector<128x128xf32>
      %31 = arith.addf %30, %27 : vector<128x128xf32>
      %32 = arith.mulf %19, %27 : vector<128x128xf32>
      %33 = vector.shape_cast %31 : vector<128x128xf32> to vector<16x8x128xf32>
      %cst_10 = arith.constant dense<0.000000e+00> : vector<8x128xf32>
      %34 = vector.multi_reduction <add>, %33, %cst_10 [0] : vector<16x8x128xf32> to vector<8x128xf32>
      %35 = arith.addf %13, %34 : vector<8x128xf32>
      %36 = vector.shape_cast %32 : vector<128x128xf32> to vector<16x8x128xf32>
      %cst_11 = arith.constant dense<0.000000e+00> : vector<8x128xf32>
      %37 = vector.multi_reduction <add>, %36, %cst_11 [0] : vector<16x8x128xf32> to vector<8x128xf32>
      %38 = arith.addf %13, %37 : vector<8x128xf32>
      %39 = vector.shape_cast %19 : vector<128x128xf32> to vector<16x8x128xf32>
      %cst_12 = arith.constant dense<0.000000e+00> : vector<8x128xf32>
      %40 = vector.multi_reduction <add>, %39, %cst_12 [0] : vector<16x8x128xf32> to vector<8x128xf32>
      %41 = arith.addf %13, %40 : vector<8x128xf32>
      %c1_i32_13 = arith.constant 1 : i32
      %c0_14 = arith.constant 0 : index
      %c0_15 = arith.constant 0 : index
      %42 = vector.load %arg4[%c0_14, %c0_15] : memref<24x128xf32, #tpu.memory_space<vmem>>, vector<8x128xf32>
      %43 = arith.addf %42, %35 : vector<8x128xf32>
      %c0_16 = arith.constant 0 : index
      %c0_17 = arith.constant 0 : index
      %44 = vector.load %arg4[%c0_16, %c0_17] : memref<24x128xf32, #tpu.memory_space<vmem>>, vector<8x128xf32>
      tpu.vector_store %arg4[%c0_16, %c0_17], %43 {strides = array<i32>} : memref<24x128xf32, #tpu.memory_space<vmem>>, vector<8x128xf32>,
      %c8 = arith.constant 8 : index
      %c0_18 = arith.constant 0 : index
      %45 = vector.load %arg4[%c8, %c0_18] : memref<24x128xf32, #tpu.memory_space<vmem>>, vector<8x128xf32>
      %46 = arith.addf %45, %38 : vector<8x128xf32>
      %c8_19 = arith.constant 8 : index
      %c0_20 = arith.constant 0 : index
      %47 = vector.load %arg4[%c8_19, %c0_20] : memref<24x128xf32, #tpu.memory_space<vmem>>, vector<8x128xf32>
      tpu.vector_store %arg4[%c8_19, %c0_20], %46 {strides = array<i32>} : memref<24x128xf32, #tpu.memory_space<vmem>>, vector<8x128xf32>,
      %c16 = arith.constant 16 : index
      %c0_21 = arith.constant 0 : index
      %48 = vector.load %arg4[%c16, %c0_21] : memref<24x128xf32, #tpu.memory_space<vmem>>, vector<8x128xf32>
      %49 = arith.addf %48, %41 : vector<8x128xf32>
      %c16_22 = arith.constant 16 : index
      %c0_23 = arith.constant 0 : index
      %50 = vector.load %arg4[%c16_22, %c0_23] : memref<24x128xf32, #tpu.memory_space<vmem>>, vector<8x128xf32>
      tpu.vector_store %arg4[%c16_22, %c0_23], %49 {strides = array<i32>} : memref<24x128xf32, #tpu.memory_space<vmem>>, vector<8x128xf32>,
    } else {
    }
    %11 = arith.extui %7 : i1 to i32
    %c0_i32_3 = arith.constant 0 : i32
    %12 = arith.cmpi ne, %11, %c0_i32_3 : i32
    scf.if %12 {
      %cst = arith.constant 0.000000e+00 : f32
      %13 = vector.broadcast %cst : f32 to vector<8x128xf32>
      %c0_i32_4 = arith.constant 0 : i32
      %c128_i32_5 = arith.constant 128 : i32
      %14 = arith.muli %c0_i32_4, %c128_i32_5 : i32
      %15 = tpu.assume_multiple %14, 128 : i32
      %16 = arith.index_cast %15 : i32 to index
      %c0 = arith.constant 0 : index
      %17 = vector.load %arg2[%16, %c0] : memref<128x128xf32, #tpu.memory_space<vmem>>, vector<128x128xf32>
      %18 = arith.index_cast %15 : i32 to index
      %c0_6 = arith.constant 0 : index
      %19 = vector.load %arg3[%18, %c0_6] : memref<128x128xf32, #tpu.memory_space<vmem>>, vector<128x128xf32>
      %cst_7 = arith.constant 0.000000e+00 : f32
      %20 = vector.broadcast %cst_7 : f32 to vector<128x128xf32>
      %21 = arith.subf %20, %17 : vector<128x128xf32>
      %22 = arith.minimumf %21, %17 : vector<128x128xf32>
      %23 = math.exp %22 : vector<128x128xf32>
      %24 = math.log1p %23 : vector<128x128xf32>
      %cst_8 = arith.constant 0.000000e+00 : f32
      %25 = vector.broadcast %cst_8 : f32 to vector<128x128xf32>
      %26 = arith.maximumf %21, %25 : vector<128x128xf32>
      %27 = arith.addf %24, %26 : vector<128x128xf32>
      %cst_9 = arith.constant 1.000000e+00 : f32
      %28 = vector.broadcast %cst_9 : f32 to vector<128x128xf32>
      %29 = arith.subf %28, %19 : vector<128x128xf32>
      %30 = arith.mulf %29, %17 : vector<128x128xf32>
      %31 = arith.addf %30, %27 : vector<128x128xf32>
      %32 = arith.mulf %19, %27 : vector<128x128xf32>
      %33 = arith.addi %5, %15 : i32
      %34 = tpu.iota {dimensions = array<i32: 0>} : vector<128x128xi32>
      %35 = vector.broadcast %33 : i32 to vector<128x128xi32>
      %36 = arith.addi %35, %34 : vector<128x128xi32>
      %c16_i32_10 = arith.constant 16 : i32
      %37 = vector.broadcast %c16_i32_10 : i32 to vector<128x128xi32>
      %38 = arith.cmpi slt, %36, %37 : vector<128x128xi32>
      %cst_11 = arith.constant 0.000000e+00 : f32
      %39 = vector.broadcast %cst_11 : f32 to vector<128x128xf32>
      %40 = arith.select %38, %31, %39 : vector<128x128xi1>, vector<128x128xf32>
      %cst_12 = arith.constant 0.000000e+00 : f32
      %41 = vector.broadcast %cst_12 : f32 to vector<128x128xf32>
      %42 = arith.select %38, %32, %41 : vector<128x128xi1>, vector<128x128xf32>
      %cst_13 = arith.constant 0.000000e+00 : f32
      %43 = vector.broadcast %cst_13 : f32 to vector<128x128xf32>
      %44 = arith.select %38, %19, %43 : vector<128x128xi1>, vector<128x128xf32>
      %45 = vector.shape_cast %40 : vector<128x128xf32> to vector<16x8x128xf32>
      %cst_14 = arith.constant dense<0.000000e+00> : vector<8x128xf32>
      %46 = vector.multi_reduction <add>, %45, %cst_14 [0] : vector<16x8x128xf32> to vector<8x128xf32>
      %47 = arith.addf %13, %46 : vector<8x128xf32>
      %48 = vector.shape_cast %42 : vector<128x128xf32> to vector<16x8x128xf32>
      %cst_15 = arith.constant dense<0.000000e+00> : vector<8x128xf32>
      %49 = vector.multi_reduction <add>, %48, %cst_15 [0] : vector<16x8x128xf32> to vector<8x128xf32>
      %50 = arith.addf %13, %49 : vector<8x128xf32>
      %51 = vector.shape_cast %44 : vector<128x128xf32> to vector<16x8x128xf32>
      %cst_16 = arith.constant dense<0.000000e+00> : vector<8x128xf32>
      %52 = vector.multi_reduction <add>, %51, %cst_16 [0] : vector<16x8x128xf32> to vector<8x128xf32>
      %53 = arith.addf %13, %52 : vector<8x128xf32>
      %c1_i32_17 = arith.constant 1 : i32
      %c0_18 = arith.constant 0 : index
      %c0_19 = arith.constant 0 : index
      %54 = vector.load %arg4[%c0_18, %c0_19] : memref<24x128xf32, #tpu.memory_space<vmem>>, vector<8x128xf32>
      %55 = arith.addf %54, %47 : vector<8x128xf32>
      %c0_20 = arith.constant 0 : index
      %c0_21 = arith.constant 0 : index
      %56 = vector.load %arg4[%c0_20, %c0_21] : memref<24x128xf32, #tpu.memory_space<vmem>>, vector<8x128xf32>
      tpu.vector_store %arg4[%c0_20, %c0_21], %55 {strides = array<i32>} : memref<24x128xf32, #tpu.memory_space<vmem>>, vector<8x128xf32>,
      %c8 = arith.constant 8 : index
      %c0_22 = arith.constant 0 : index
      %57 = vector.load %arg4[%c8, %c0_22] : memref<24x128xf32, #tpu.memory_space<vmem>>, vector<8x128xf32>
      %58 = arith.addf %57, %50 : vector<8x128xf32>
      %c8_23 = arith.constant 8 : index
      %c0_24 = arith.constant 0 : index
      %59 = vector.load %arg4[%c8_23, %c0_24] : memref<24x128xf32, #tpu.memory_space<vmem>>, vector<8x128xf32>
      tpu.vector_store %arg4[%c8_23, %c0_24], %58 {strides = array<i32>} : memref<24x128xf32, #tpu.memory_space<vmem>>, vector<8x128xf32>,
      %c16 = arith.constant 16 : index
      %c0_25 = arith.constant 0 : index
      %60 = vector.load %arg4[%c16, %c0_25] : memref<24x128xf32, #tpu.memory_space<vmem>>, vector<8x128xf32>
      %61 = arith.addf %60, %53 : vector<8x128xf32>
      %c16_26 = arith.constant 16 : index
      %c0_27 = arith.constant 0 : index
      %62 = vector.load %arg4[%c16_26, %c0_27] : memref<24x128xf32, #tpu.memory_space<vmem>>, vector<8x128xf32>
      tpu.vector_store %arg4[%c16_26, %c0_27], %61 {strides = array<i32>} : memref<24x128xf32, #tpu.memory_space<vmem>>, vector<8x128xf32>,
    } else {
    }
    return
  }
  func.func @transform_0(%arg0: i32, %arg1: i32) -> (i32, i32) {
    %c1_i32 = arith.constant 1 : i32
    %0 = arith.muli %arg0, %c1_i32 : i32
    %1 = arith.addi %0, %arg1 : i32
    %c0_i32 = arith.constant 0 : i32
    %c0_i32_0 = arith.constant 0 : i32
    return %1, %c0_i32 : i32, i32
  }
  func.func @transform_1(%arg0: i32, %arg1: i32) -> (i32, i32) {
    %c1_i32 = arith.constant 1 : i32
    %0 = arith.muli %arg0, %c1_i32 : i32
    %1 = arith.addi %0, %arg1 : i32
    %c0_i32 = arith.constant 0 : i32
    %c0_i32_0 = arith.constant 0 : i32
    return %1, %c0_i32 : i32, i32
  }
  func.func @transform_2(%arg0: i32, %arg1: i32) -> (i32, i32) {
    %c0_i32 = arith.constant 0 : i32
    %c0_i32_0 = arith.constant 0 : i32
    return %arg0, %c0_i32 : i32, i32
  }
}

</mosaic_0001>

<bundles_post_ra>
// kernel: tpu_custom_call.1
= control target key start
LH: loop header
LB: loop body
LE: loop exit
PB: predicated region body
PF: predicated region fallthrough
CT: control target
= control target key end

     0   :  { %7 = vsyncpa [#allocation3], 0  ;;  %s1136_s0 = inlined_call_operand.hbm [shape: f32[16,128], index: 0, kind: input, shape index: {}]   ;;  %s1137_s1 = inlined_call_operand.hbm [shape: f32[16,128], index: 1, kind: input, shape index: {}]   ;;  %s1138_s2 = inlined_call_operand.hbm [shape: f32[24,128], index: 2, kind: output, shape index: {}]  }
   0x1   :  { %8 = vsyncpa [#allocation6], 0 }
   0x2   :  { %9 = vsyncpa [#allocation4], 0 }
   0x3   :  { %18 = vsyncadd [#allocation3], 1792  ;;  %s1071_s9 = smov [#allocation2]   ;;  %s999_s13 = scalar_lea.hbm %s1136_s0, 256 }
   0x4   :  { %s23_s10 = sshll.u32 %s1071_s9, 4  ;;  %p1000_p0 = scmp.ne.s32.totalorder %s1136_s0, %s999_s13  ;;  %s24_s10 = int_to_ptr.vmem [resolvable:$true] %s23_s10 }
   0x5   :  { %p1003_p1 = scmp.lt.u32.totalorder %s999_s13, %s1136_s0 }
   0x7   :  { %p1005_p2 = pnand %p1003_p1, %p1000_p0 }
   0x9   :  { %1008 = shalt.err (!%p1005_p2)
}
   0xa   :  { %s1009_s18 = scalar_lea.vmem %s24_s10, 256  ;;  %s1013_s19 = scalar_lea.vmem %s24_s10, 2048 }
   0xb   :  { %p1010_p3 = scmp.ne.s32.totalorder %s24_s10, %s1009_s18  ;;  %p1014_p4 = scmp.lt.s32.totalorder %s24_s10, %s24_s10 }
   0xc   :  { %p1015_p5 = scmp.lt.s32.totalorder %s1013_s19, %s1009_s18 }
   0xe   :  { %p1016_p6 = por %p1015_p5, %p1014_p4 }
  0x10   :  { %p1017_p7 = pnand %p1016_p6, %p1010_p3 }
  0x12   :  { %1020 = shalt.err (!%p1017_p7)
}
  0x13   :  { %s1072_s20 = smov 128   ;;  %s1073_s21 = smov 8  }
  0x14   :  { %29 = dma.hbm_to_vmem [thread:$0]  %s1136_s0, 256, %s24_s10, [#allocation3], %s1072_s20, %s1072_s20, %s1073_s21  }
  0x15   :  { %38 = vsyncadd [#allocation6], 1792  ;;  %s1074_s24 = smov [#allocation5]   ;;  %s1021_s28 = scalar_lea.hbm %s1137_s1, 256 }
  0x16   :  { %s43_s25 = sshll.u32 %s1074_s24, 4  ;;  %p1022_p8 = scmp.ne.s32.totalorder %s1137_s1, %s1021_s28  ;;  %s44_s25 = int_to_ptr.vmem [resolvable:$true] %s43_s25 }
  0x17   :  { %p1025_p9 = scmp.lt.u32.totalorder %s1021_s28, %s1137_s1 }
  0x19   :  { %p1027_p10 = pnand %p1025_p9, %p1022_p8 }
  0x1b   :  { %1030 = shalt.err (!%p1027_p10)
}
  0x1c   :  { %s1031_s5 = scalar_lea.vmem %s44_s25, 256  ;;  %s1035_s0 = scalar_lea.vmem %s44_s25, 2048 }
  0x1d   :  { %p1032_p11 = scmp.ne.s32.totalorder %s44_s25, %s1031_s5  ;;  %p1036_p12 = scmp.lt.s32.totalorder %s44_s25, %s44_s25 }
  0x1e   :  { %p1037_p13 = scmp.lt.s32.totalorder %s1035_s0, %s1031_s5 }
  0x20   :  { %p1038_p0 = por %p1037_p13, %p1036_p12 }
  0x22   :  { %p1039_p1 = pnand %p1038_p0, %p1032_p11 }
  0x24   :  { %1042 = shalt.err (!%p1039_p1)
}
  0x25   :  { %49 = dma.hbm_to_vmem [thread:$0]  %s1137_s1, 256, %s44_s25, [#allocation6], %s1072_s20, %s1072_s20, %s1073_s21  }
  0x26   :  { %1065 = dma.done.wait [#allocation3], 2048  }
  0x27   :  { %1066 = vsyncadd [#allocation3], 4294965248 }
  0x28   :  { %1067 = dma.done.wait [#allocation6], 2048  }
  0x29   :  { %1068 = vsyncadd [#allocation6], 4294965248  ;;  %v475_v0 = vld [vmem:[#allocation2] sm:$0xff]  ;;  %v476_v1 = vld [vmem:[#allocation2 + $0x8] sm:$0xff]  ;;  %s1075_s1 = smov [#allocation7]  }
  0x2a   :  { %v491_v2 = vld [vmem:[#allocation5] sm:$0xff]  ;;  %v492_v3 = vld [vmem:[#allocation5 + $0x8] sm:$0xff]  ;;  %v507_v4 = vsub.f32 0.0, %v475_v0  ;;  %v508_v5 = vsub.f32 0.0, %v476_v1  ;;  %s972_s8 = sshll.u32 %s1075_s1, 4  ;;  %s973_s8 = int_to_ptr.vmem [resolvable:$true] %s972_s8 }
  0x2b   :  { %v942_v6 = vadd.f32 %v492_v3, %v491_v2  ;;  %v747_v21 = vsub.f32 1.0, %v491_v2  ;;  %v748_v23 = vsub.f32 1.0, %v492_v3  ;;  %s1043_s9 = scalar_lea.vmem %s973_s8, 384  ;;  %p1048_p3 = scmp.lt.s32.totalorder %s973_s8, %s973_s8 }
  0x2c   :  { %v523_v7 = vmin.f32 %v507_v4, %v475_v0  ;;  %v524_v8 = vmin.f32 %v508_v5, %v476_v1  ;;  %v715_v26 = vmax.f32 %v507_v4, 0.0  ;;  %v716_v29 = vmax.f32 %v508_v5, 0.0  ;;  %p1044_p2 = scmp.ne.s32.totalorder %s973_s8, %s1043_s9  ;;  %p1049_p4 = scmp.lt.s32.totalorder %s1043_s9, %s1043_s9 }
  0x2d   :  { %966 = vst [vmem:[#allocation7 + $0x10] sm:$0xff] %v942_v6  ;;  %v763_v31 = vmul.f32 %v747_v21, %v475_v0  ;;  %v764_v33 = vmul.f32 %v748_v23, %v476_v1 }
  0x2e   :  { %v539_v9 = vmul.f32 1.442695, %v523_v7  ;;  %v541_v10 = vmul.f32 1.442695, %v524_v8  ;;  %p1050_p5 = por %p1049_p4, %p1048_p3 }
  0x30   :  { %991 = vpow2.f32 %v539_v9  ;;  %p1051_p6 = pnand %p1050_p5, %p1044_p2 }
  0x31   :  { %993 = vpow2.f32 %v541_v10 }
  0x3a   :  { %v992_v11 = vpop.eup %991 }
  0x3b   :  { %v994_v12 = vpop.eup %993  ;;  %v571_v13 = vadd.f32 1.0, %v992_v11  ;;  %v574_v15 = vmul.f32 -0.5, %v992_v11  ;;  %v577_v18 = vand.u32 2147483647, %v992_v11 }
  0x3c   :  { %v580_v14 = vadd.f32 1.0, %v994_v12  ;;  %v583_v16 = vmul.f32 -0.5, %v994_v12  ;;  %v586_v20 = vand.u32 2147483647, %v994_v12 }
  0x3d   :  { %995 = vlog2.f32 %v571_v13  ;;  %v575_v17 = vadd.f32 1.0, %v574_v15  ;;  %vm578_vm0 = vcmp.lt.f32.partialorder %v577_v18, 0.0004427343 }
  0x3e   :  { %997 = vlog2.f32 %v580_v14  ;;  %v584_v19 = vadd.f32 1.0, %v583_v16  ;;  %vm587_vm1 = vcmp.lt.f32.partialorder %v586_v20, 0.0004427343 }
  0x3f   :  { %v576_v22 = vmul.f32 %v992_v11, %v575_v17 }
  0x40   :  { %v585_v25 = vmul.f32 %v994_v12, %v584_v19 }
  0x47   :  { %v996_v24 = vpop.eup %995 }
  0x48   :  { %v998_v27 = vpop.eup %997  ;;  %v573_v28 = vmul.f32 0.6931472, %v996_v24 }
  0x49   :  { %v582_v30 = vmul.f32 0.6931472, %v998_v27 }
  0x4a   :  { %v579_v32 = vsel %vm578_vm0, %v576_v22, %v573_v28 }
  0x4b   :  { %v588_v34 = vsel %vm587_vm1, %v585_v25, %v582_v30  ;;  %v731_v35 = vadd.f32 %v715_v26, %v579_v32 }
  0x4c   :  { %v732_v36 = vadd.f32 %v716_v29, %v588_v34 }
  0x4d   :  { %v779_v37 = vadd.f32 %v763_v31, %v731_v35  ;;  %v795_v38 = vmul.f32 %v731_v35, %v491_v2 }
  0x4e   :  { %v780_v39 = vadd.f32 %v764_v33, %v732_v36  ;;  %v796_v40 = vmul.f32 %v732_v36, %v492_v3 }
  0x50   :  { %v910_v41 = vadd.f32 %v780_v39, %v779_v37  ;;  %v926_v42 = vadd.f32 %v796_v40, %v795_v38 }
  0x52   :  { %960 = vst [vmem:[#allocation7] sm:$0xff] %v910_v41  ;;  %963 = vst [vmem:[#allocation7 + $0x8] sm:$0xff] %v926_v42 }
  0x53   :  { %1054 = shalt.err (!%p1051_p6)
}
  0x54   :  { %s1055_s12 = scalar_lea.hbm %s1138_s2, 384 }
  0x55   :  { %p1056_p7 = scmp.ne.s32.totalorder %s1138_s2, %s1055_s12  ;;  %p1059_p8 = scmp.lt.u32.totalorder %s1055_s12, %s1138_s2 }
  0x57   :  { %p1061_p9 = pnand %p1059_p8, %p1056_p7 }
  0x59   :  { %1064 = shalt.err (!%p1061_p9)
}
  0x5a   :  { %978 = dma.vmem_to_hbm [thread:$0]  %s973_s8, 384, %s1138_s2, [#allocation4], %s1072_s20, %s1072_s20, %s1073_s21  }
  0x5b   :  { %1069 = dma.done.wait [#allocation4], 384  }
  0x5c   :  { %1070 = vsyncadd [#allocation4], 4294966912 }
  0x5d   :  { %982 = vsyncpa [#allocation3], 1 }
  0x5e   :  { %983 = vsyncpa [#allocation6], 1 }
  0x5f   :  { %984 = vsyncpa [#allocation4], 1 }

</bundles_post_ra>
